<compile_context>
chip_gen: v6e
topology: v6e:2x2x1
jax: 0.10.0
libtpu: 0.0.40
codegen_flags: <defaults>
</compile_context>

<pallas_src>
import math
import functools

import jax
import jax.numpy as jnp
from jax.experimental import pallas as pl
from jax.experimental.pallas import tpu as pltpu


def _round_up(x: int, m: int) -> int:
    return (x + m - 1) // m * m


# --------------------------------------------------------------------------------------
# Pass 1: tiled global average pool -> conv1d (banded matmul) -> sigmoid  ==>  gate (B,C)
# --------------------------------------------------------------------------------------
def _pool_gate_kernel(band_ref, x_ref, gate_ref, acc_ref, *, inv_hw: float):
    """grid = (B tiles [parallel], HW tiles [arbitrary reduction]).

    band_ref: VMEM f32[C_pad, C_pad]   (precomputed conv band matrix, resident)
    x_ref:    VMEM   [b_tile, C_pad, hw_tile]
    gate_ref: VMEM f32[b_tile, C_pad]  (output, written at last HW step only)
    acc_ref:  VMEM f32[b_tile, C_pad]  (spatial-sum accumulator scratch)
    """
    hw = pl.program_id(1)

    @pl.when(hw == 0)
    def _init():
        acc_ref[...] = jnp.zeros_like(acc_ref)

    # Per-tile spatial partial sum. Padded spatial lanes are zero (wrapper pads with 0),
    # so they do not perturb the sum; 1/(H*W) uses the TRUE spatial size.
    acc_ref[...] += jnp.sum(x_ref[...].astype(jnp.float32), axis=-1)

    @pl.when(hw == pl.num_programs(1) - 1)
    def _finalize():
        pooled = acc_ref[...] * inv_hw                                   # (b_tile, C_pad)
        # Channel-axis Conv1d (zero padded) as a tiny banded matmul; the band matrix is
        # built once in the wrapper, so no per-step iota/where materialization in-kernel.
        y = jnp.dot(pooled, band_ref[...], preferred_element_type=jnp.float32)
        gate_ref[...] = jax.nn.sigmoid(y)


# --------------------------------------------------------------------------------------
# Pass 2: out = x * gate  (gate broadcast over the spatial lane axis)
# --------------------------------------------------------------------------------------
def _scale_kernel(gate_ref, x_ref, o_ref):
    gate = gate_ref[...][:, :, None]                                     # (b_tile, C_pad, 1)
    o_ref[...] = (x_ref[...] * gate).astype(o_ref.dtype)


# --------------------------------------------------------------------------------------
# Wrapper
# --------------------------------------------------------------------------------------
def _band_matrix(conv_w: jax.Array, C: int, C_pad: int) -> jax.Array:
    """band[c_in, c_out] = w[c_in - c_out + pad] inside the band (zero-padded conv)."""
    k = conv_w.shape[0]
    pad = (k - 1) // 2
    c_in = jnp.arange(C_pad)[:, None]
    c_out = jnp.arange(C_pad)[None, :]
    tap = c_in - c_out + pad
    valid = (tap >= 0) & (tap < k) & (c_in < C) & (c_out < C)
    return jnp.where(valid, conv_w[jnp.clip(tap, 0, k - 1)], 0.0).astype(jnp.float32)


def _choose_tiles(B: int, C_pad: int, HW: int, elem_bytes: int,
                  target_bytes: int = 2 * 1024 * 1024):
    """Pick lane-dense, sublane-friendly tiles that keep the pipeline within scoped VMEM
    on every TPU generation (v7x has only 64 MiB physical / 32 MiB scoped)."""
    hw128 = _round_up(HW, 128)
    # Batch tile: full batch when small (full-dim exception to the (8,128) rule),
    # otherwise a multiple of 8 sublanes.
    b_tile = B if B < 8 else 8
    B_pad = _round_up(B, b_tile)
    # Largest multiple-of-128 spatial tile whose x block stays under the budget.
    max_hw = (target_bytes // max(1, b_tile * C_pad * elem_bytes)) // 128 * 128
    hw_tile = int(min(hw128, max(128, max_hw)))
    HW_pad = _round_up(HW, hw_tile)
    return b_tile, B_pad, hw_tile, HW_pad


@jax.jit
def eca_block_forward(x_nchw: jax.Array, conv_w: jax.Array) -> jax.Array:
    """x_nchw: [B, C, H, W]; conv_w: [k] (Conv1d(1,1,k,bias=False) weight squeezed)."""
    B, C, H, W = x_nchw.shape
    HW = H * W
    C_pad = _round_up(C, 8)
    elem_bytes = jnp.dtype(x_nchw.dtype).itemsize
    b_tile, B_pad, hw_tile, HW_pad = _choose_tiles(B, C_pad, HW, elem_bytes)

    x_flat = x_nchw.reshape(B, C, HW)
    if (B_pad, C_pad, HW_pad) != (B, C, HW):
        x_pad = jnp.pad(x_flat, ((0, B_pad - B), (0, C_pad - C), (0, HW_pad - HW)))
    else:
        x_pad = x_flat

    band = _band_matrix(conv_w, C, C_pad)                                # (C_pad, C_pad) f32
    grid = (B_pad // b_tile, HW_pad // hw_tile)

    # ---- Pass 1: pooled mean -> conv -> sigmoid gate (B_pad, C_pad) ----
    gate = pl.pallas_call(
        functools.partial(_pool_gate_kernel, inv_hw=1.0 / float(HW)),
        out_shape=jax.ShapeDtypeStruct((B_pad, C_pad), jnp.float32),
        grid=grid,
        in_specs=[
            pl.BlockSpec((C_pad, C_pad), lambda b, h: (0, 0)),               # band (resident)
            pl.BlockSpec((b_tile, C_pad, hw_tile), lambda b, h: (b, 0, h)),  # x tile
        ],
        out_specs=pl.BlockSpec((b_tile, C_pad), lambda b, h: (b, 0)),
        scratch_shapes=[pltpu.VMEM((b_tile, C_pad), jnp.float32)],
        compiler_params=pltpu.CompilerParams(
            dimension_semantics=("parallel", "arbitrary")),
    )(band, x_pad)

    # ---- Pass 2: out = x * gate, fully parallel tiled scale ----
    out_pad = pl.pallas_call(
        _scale_kernel,
        out_shape=jax.ShapeDtypeStruct((B_pad, C_pad, HW_pad), x_nchw.dtype),
        grid=grid,
        in_specs=[
            pl.BlockSpec((b_tile, C_pad), lambda b, h: (b, 0)),              # gate (tiny)
            pl.BlockSpec((b_tile, C_pad, hw_tile), lambda b, h: (b, 0, h)),  # x tile
        ],
        out_specs=pl.BlockSpec((b_tile, C_pad, hw_tile), lambda b, h: (b, 0, h)),
        compiler_params=pltpu.CompilerParams(
            dimension_semantics=("parallel", "parallel")),
    )(gate, x_pad)

    return out_pad[:B, :C, :HW].reshape(B, C, H, W)


def _eca_reference(x, conv_w):
    """Pure-JAX reference matching the PyTorch module."""
    k = conv_w.shape[0]
    pad = (k - 1) // 2
    pooled = jnp.mean(x, axis=(2, 3))                          # (B, C)
    padded = jnp.pad(pooled, ((0, 0), (pad, pad)))             # (B, C + 2*pad)
    y = sum(conv_w[j] * padded[:, j:j + x.shape[1]] for j in range(k))
    gate = jax.nn.sigmoid(y)[:, :, None, None]
    return x * gate


if __name__ == "__main__":
    # Module config: channel=8 -> kernel_size = int(|(log2(8)+1)/2|) = 2 -> odd-ified to 3
    B, C, H, W = 2, 8, 16, 16
    channel, b_hp, gamma = C, 1, 2
    kernel_size = int(abs((math.log(channel, 2) + b_hp) / gamma))
    kernel_size = kernel_size if kernel_size % 2 else kernel_size + 1

    key = jax.random.PRNGKey(0)
    kx, kw = jax.random.split(key)
    x = jax.random.normal(kx, (B, C, H, W), dtype=jnp.float32)
    # Deterministic Conv1d(1,1,k,bias=False) weight init (uniform like PyTorch default).
    bound = 1.0 / math.sqrt(1 * kernel_size)
    conv_w = jax.random.uniform(kw, (kernel_size,), minval=-bound, maxval=bound,
                                dtype=jnp.float32)

    out = eca_block_forward(x, conv_w)
    out = jax.block_until_ready(out)

    ref = _eca_reference(x, conv_w)
    assert out.shape == x.shape and out.dtype == x.dtype
    assert jnp.allclose(out, ref, atol=1e-5, rtol=1e-5)

    print("KERNEL_OK")
</pallas_src>

<mosaic_0001>
module attributes {stable_mosaic.version = 11 : i64} {
  func.func @_pool_gate_kernel(%arg0: i32, %arg1: i32, %arg2: memref<8x8xf32, #tpu.memory_space<vmem>>, %arg3: memref<2x8x256xf32, #tpu.memory_space<vmem>>, %arg4: memref<2x8xf32, #tpu.memory_space<vmem>>, %arg5: memref<2x8xf32, #tpu.memory_space<vmem>>) attributes {dimension_semantics = [#tpu.dimension_semantics<parallel>, #tpu.dimension_semantics<arbitrary>], iteration_bounds = array<i64: 1, 1>, scalar_prefetch = 0 : i64, scratch_operands = 1 : i64, tpu.core_type = #tpu.core_type<tc>, window_params = [{pipeline_mode = #tpu.pipeline_mode<synchronous>, transform_indices = @transform_0, window_bounds = array<i64: 8, 8>}, {transform_indices = @transform_1, window_bounds = array<i64: 2, 8, 256>}, {transform_indices = @transform_2, window_bounds = array<i64: 2, 8>}]} {
    %c0_i32 = arith.constant 0 : i32
    %0 = arith.cmpi eq, %arg1, %c0_i32 : i32
    %1 = arith.extui %0 : i1 to i32
    %c0_i32_0 = arith.constant 0 : i32
    %2 = arith.cmpi ne, %1, %c0_i32_0 : i32
    scf.if %2 {
      %cst_9 = arith.constant 0.000000e+00 : f32
      %11 = vector.broadcast %cst_9 : f32 to vector<2x8xf32>
      %c0_10 = arith.constant 0 : index
      %c0_11 = arith.constant 0 : index
      %12 = vector.load %arg5[%c0_10, %c0_11] : memref<2x8xf32, #tpu.memory_space<vmem>>, vector<2x8xf32>
      tpu.vector_store %arg5[%c0_10, %c0_11], %11 {strides = array<i32>} : memref<2x8xf32, #tpu.memory_space<vmem>>, vector<2x8xf32>,
    } else {
    }
    %c0 = arith.constant 0 : index
    %c0_1 = arith.constant 0 : index
    %3 = vector.load %arg5[%c0, %c0_1] : memref<2x8xf32, #tpu.memory_space<vmem>>, vector<2x8xf32>
    %c0_2 = arith.constant 0 : index
    %c0_3 = arith.constant 0 : index
    %c0_4 = arith.constant 0 : index
    %4 = vector.load %arg3[%c0_2, %c0_3, %c0_4] : memref<2x8x256xf32, #tpu.memory_space<vmem>>, vector<2x8x256xf32>
    %cst = arith.constant dense<0.000000e+00> : vector<2x8xf32>
    %5 = vector.multi_reduction <add>, %4, %cst [2] : vector<2x8x256xf32> to vector<2x8xf32>
    %6 = arith.addf %3, %5 : vector<2x8xf32>
    %c0_5 = arith.constant 0 : index
    %c0_6 = arith.constant 0 : index
    %7 = vector.load %arg5[%c0_5, %c0_6] : memref<2x8xf32, #tpu.memory_space<vmem>>, vector<2x8xf32>
    tpu.vector_store %arg5[%c0_5, %c0_6], %6 {strides = array<i32>} : memref<2x8xf32, #tpu.memory_space<vmem>>, vector<2x8xf32>,
    %c0_i32_7 = arith.constant 0 : i32
    %8 = arith.cmpi eq, %arg1, %c0_i32_7 : i32
    %9 = arith.extui %8 : i1 to i32
    %c0_i32_8 = arith.constant 0 : i32
    %10 = arith.cmpi ne, %9, %c0_i32_8 : i32
    scf.if %10 {
      %c0_9 = arith.constant 0 : index
      %c0_10 = arith.constant 0 : index
      %11 = vector.load %arg5[%c0_9, %c0_10] : memref<2x8xf32, #tpu.memory_space<vmem>>, vector<2x8xf32>
      %cst_11 = arith.constant 3.906250e-03 : f32
      %12 = vector.broadcast %cst_11 : f32 to vector<2x8xf32>
      %13 = arith.mulf %11, %12 : vector<2x8xf32>
      %c0_12 = arith.constant 0 : index
      %c0_13 = arith.constant 0 : index
      %14 = vector.load %arg2[%c0_12, %c0_13] : memref<8x8xf32, #tpu.memory_space<vmem>>, vector<8x8xf32>
      %cst_14 = arith.constant dense<0.000000e+00> : vector<2x8xf32>
      %15 = tpu.matmul %13, %14, %cst_14 {dimension_numbers = #tpu.dot_dimension_numbers<[1], [0], [0], [1], [0, 0, 1, 1], [], []>} : vector<2x8xf32>, vector<8x8xf32>, vector<2x8xf32> -> vector<2x8xf32>
      %16 = arith.negf %15 : vector<2x8xf32>
      %17 = math.exp %16 : vector<2x8xf32>
      %cst_15 = arith.constant 1.000000e+00 : f32
      %18 = vector.broadcast %cst_15 : f32 to vector<2x8xf32>
      %19 = arith.addf %18, %17 : vector<2x8xf32>
      %20 = arith.divf %18, %19 : vector<2x8xf32>
      %c0_16 = arith.constant 0 : index
      %c0_17 = arith.constant 0 : index
      %21 = vector.load %arg4[%c0_16, %c0_17] : memref<2x8xf32, #tpu.memory_space<vmem>>, vector<2x8xf32>
      tpu.vector_store %arg4[%c0_16, %c0_17], %20 {strides = array<i32>} : memref<2x8xf32, #tpu.memory_space<vmem>>, vector<2x8xf32>,
    } else {
    }
    return
  }
  func.func @transform_0(%arg0: i32, %arg1: i32) -> (i32, i32) {
    %c0_i32 = arith.constant 0 : i32
    %c0_i32_0 = arith.constant 0 : i32
    %c0_i32_1 = arith.constant 0 : i32
    return %c0_i32, %c0_i32_0 : i32, i32
  }
  func.func @transform_1(%arg0: i32, %arg1: i32) -> (i32, i32, i32) {
    %c0_i32 = arith.constant 0 : i32
    %c0_i32_0 = arith.constant 0 : i32
    return %arg0, %c0_i32, %arg1 : i32, i32, i32
  }
  func.func @transform_2(%arg0: i32, %arg1: i32) -> (i32, i32) {
    %c0_i32 = arith.constant 0 : i32
    %c0_i32_0 = arith.constant 0 : i32
    return %arg0, %c0_i32 : i32, i32
  }
}

module attributes {stable_mosaic.version = 11 : i64} {
  func.func @_scale_kernel(%arg0: i32, %arg1: i32, %arg2: memref<2x8xf32, #tpu.memory_space<vmem>>, %arg3: memref<2x8x256xf32, #tpu.memory_space<vmem>>, %arg4: memref<2x8x256xf32, #tpu.memory_space<vmem>>) attributes {dimension_semantics = [#tpu.dimension_semantics<parallel>, #tpu.dimension_semantics<parallel>], iteration_bounds = array<i64: 1, 1>, scalar_prefetch = 0 : i64, scratch_operands = 0 : i64, tpu.core_type = #tpu.core_type<tc>, window_params = [{transform_indices = @transform_0, window_bounds = array<i64: 2, 8>}, {transform_indices = @transform_1, window_bounds = array<i64: 2, 8, 256>}, {transform_indices = @transform_2, window_bounds = array<i64: 2, 8, 256>}]} {
    %c0 = arith.constant 0 : index
    %c0_0 = arith.constant 0 : index
    %0 = vector.load %arg2[%c0, %c0_0] : memref<2x8xf32, #tpu.memory_space<vmem>>, vector<2x8xf32>
    %1 = vector.shape_cast %0 : vector<2x8xf32> to vector<2x8x1xf32>
    %c0_1 = arith.constant 0 : index
    %c0_2 = arith.constant 0 : index
    %c0_3 = arith.constant 0 : index
    %2 = vector.load %arg3[%c0_1, %c0_2, %c0_3] : memref<2x8x256xf32, #tpu.memory_space<vmem>>, vector<2x8x256xf32>
    %3 = vector.broadcast %1 : vector<2x8x1xf32> to vector<2x8x256xf32>
    %4 = arith.mulf %2, %3 : vector<2x8x256xf32>
    %c0_4 = arith.constant 0 : index
    %c0_5 = arith.constant 0 : index
    %c0_6 = arith.constant 0 : index
    %5 = vector.load %arg4[%c0_4, %c0_5, %c0_6] : memref<2x8x256xf32, #tpu.memory_space<vmem>>, vector<2x8x256xf32>
    tpu.vector_store %arg4[%c0_4, %c0_5, %c0_6], %4 {strides = array<i32>} : memref<2x8x256xf32, #tpu.memory_space<vmem>>, vector<2x8x256xf32>,
    return
  }
  func.func @transform_0(%arg0: i32, %arg1: i32) -> (i32, i32) {
    %c0_i32 = arith.constant 0 : i32
    %c0_i32_0 = arith.constant 0 : i32
    return %arg0, %c0_i32 : i32, i32
  }
  func.func @transform_1(%arg0: i32, %arg1: i32) -> (i32, i32, i32) {
    %c0_i32 = arith.constant 0 : i32
    %c0_i32_0 = arith.constant 0 : i32
    return %arg0, %c0_i32, %arg1 : i32, i32, i32
  }
  func.func @transform_2(%arg0: i32, %arg1: i32) -> (i32, i32, i32) {
    %c0_i32 = arith.constant 0 : i32
    %c0_i32_0 = arith.constant 0 : i32
    return %arg0, %c0_i32, %arg1 : i32, i32, i32
  }
}

</mosaic_0001>

<bundles_post_ra>
// kernel: eca_block_forward.3
= control target key start
LH: loop header
LB: loop body
LE: loop exit
PB: predicated region body
PF: predicated region fallthrough
CT: control target
= control target key end

     0   :  { %v12_v0 = vlaneseq  ;;  %s84_s0 = inlined_call_operand.vmem [shape: f32[2,8], index: 0, kind: input, shape index: {}]   ;;  %s85_s1 = inlined_call_operand.vmem [shape: f32[2,8,256], index: 1, kind: input, shape index: {}]   ;;  %s86_s2 = inlined_call_operand.vmem [shape: f32[2,8,256], index: 2, kind: output, shape index: {}]  }
   0x1   :  { %v11_v2 = vld [vmem:[%s84_s0] sm:$0x3]  ;;  %v27_v8 = vld [vmem:[%s85_s1 + $0x8] sm:$0xff]  ;;  %v28_v12 = vld [vmem:[%s85_s1 + $0x10] sm:$0xff] }
   0x2   :  { %v13_v1 = vshrl.u32 %v12_v0, 7  ;;  %v26_v7 = vld [vmem:[%s85_s1] sm:$0xff]  ;;  %v29_v13 = vld [vmem:[%s85_s1 + $0x18] sm:$0xff] }
   0x4   :  { %v14_v3 = vsub.s32 0, %v13_v1  ;;  %v21_v4 = vsub.s32 1, %v13_v1 }
   0x6   :  { %v15_v5 = vrot.slane %v11_v2, %v14_v3  ;;  %v22_v6 = vrot.slane %v11_v2, %v21_v4 }
   0x8   :  { %17 = vbcast.lane.b32.xlu0 %v15_v5, 256 }
   0xc   :  { %24 = vbcast.lane.b32.xlu0 %v22_v6, 256 }
  0x7a   :  { %v18_v9 = vpop.permute.xlu0 %17 }
  0x7b   :  { %v30_v10 = vmul.f32 %v26_v7, %v18_v9  ;;  %v31_v11 = vmul.f32 %v27_v8, %v18_v9 }
  0x7d   :  { %34 = vst [vmem:[%s86_s2] sm:$0xff] %v30_v10  ;;  %35 = vst [vmem:[%s86_s2 + $0x8] sm:$0xff] %v31_v11 }
  0x7e   :  { %v25_v14 = vpop.permute.xlu0 %24 }
  0x7f   :  { %v32_v15 = vmul.f32 %v28_v12, %v25_v14  ;;  %v33_v16 = vmul.f32 %v29_v13, %v25_v14 }
  0x81   :  { %36 = vst [vmem:[%s86_s2 + $0x10] sm:$0xff] %v32_v15  ;;  %37 = vst [vmem:[%s86_s2 + $0x18] sm:$0xff] %v33_v16 }

// kernel: eca_block_forward.2
= control target key start
LH: loop header
LB: loop body
LE: loop exit
PB: predicated region body
PF: predicated region fallthrough
CT: control target
= control target key end

     0   :  { %vm15_vm0 = vcmask 58368   ;;  %v152_v6 = vmov 0.0   ;;  %vm153_vm1 = vmmov 0   ;;  %v30_v8 = vlaneseq  ;;  %s190_s1 = inlined_call_operand.vmem [shape: f32[2,8,256], index: 1, kind: input, shape index: {}]   ;;  %s191_s0 = inlined_call_operand.vmem [shape: f32[8,8], index: 0, kind: input, shape index: {}]   ;;  %s192_s2 = inlined_call_operand.vmem [shape: f32[2,8], index: 2, kind: output, shape index: {}]  }
   0x1   :  { %v18_v0 = vld [vmem:[%s190_s1] sm:$0xff]  ;;  %v19_v1 = vld [vmem:[%s190_s1 + $0x8] sm:$0xff]  ;;  %v20_v2 = vld [vmem:[%s190_s1 + $0x10] sm:$0xff]  ;;  %16 = vst.msk [vmem:[#allocation2] sm:$0x3] %vm15_vm0, %v152_v6  ;;  %141 = vmatprep.subr.mxu0 %v152_v6  ;;  %143 = vmatprep.mubr.msk.f32.mxu0 %vm153_vm1, %v152_v6  ;;  %vm40_vm2 = vcmask 1041409  }
   0x2   :  { %v22_v3 = vadd.f32 %v19_v1, %v18_v0  ;;  %v21_v4 = vld [vmem:[%s190_s1 + $0x18] sm:$0xff]  ;;  %v51_v7 = vld [vmem:[%s191_s0] sm:$0xff]  ;;  %v31_v9 = vand.u32 127, %v30_v8  ;;  %v33_v10 = vshrl.u32 %v30_v8, 7  ;;  %vm52_vm3 = vcmask 64512  }
   0x3   :  { %v25_v5 = vadd.f32 %v21_v4, %v20_v2  ;;  %142 = vmatpush3.msra.mxu0 %v51_v7 }
   0x4   :  { %23 = vadd.xlane.f32.xlu0 %v22_v3  ;;  %v34_v12 = vsub.s32 %v31_v9, %v33_v10 }
   0x8   :  { %26 = vadd.xlane.f32.xlu0 %v25_v5  ;;  %v17_v16 = vld [vmem:[#allocation2] sm:$0x3] }
  0x8d   :  { %v24_v11 = vpop.xlane.xlu0 %23 }
  0x8e   :  { %v35_v14 = vrot.slane %v24_v11, %v34_v12 }
  0x91   :  { %v27_v13 = vpop.xlane.xlu0 %26 }
  0x92   :  { %v39_v15 = vrot.slane %v27_v13, %v34_v12 }
  0x94   :  { %v41_v17 = vsel %vm40_vm2, %v39_v15, %v35_v14 }
  0x95   :  { %v43_v18 = vadd.f32 %v41_v17, %v17_v16 }
  0x97   :  { %45 = vst.msk [vmem:[#allocation2] sm:$0x3] %vm15_vm0, %v43_v18 }
  0x9e   :  { %v49_v19 = vld [vmem:[#allocation2] sm:$0x3] }
  0x9f   :  { %v50_v20 = vmul.f32 0.00390625, %v49_v19 }
  0xa1   :  { %144 = vmatmul.mubr.msk.f32.vlgmr.msra.gmra.mxu0 %vm52_vm3, %v50_v20 }
 0x161   :  { %v122_v21 = vpop.f32.mrf.mxu0 }
 0x162   :  { %v138_v22 = vmul.f32 -1.442695, %v122_v21 }
 0x163   :  { %v145_v23 = vpop.f32.mrf.mxu0 }
 0x164   :  { %148 = vpow2.f32 %v138_v22 }
 0x171   :  { %v149_v24 = vpop.eup %148 }
 0x172   :  { %v129_v25 = vadd.f32 1.0, %v149_v24 }
 0x174   :  { %150 = vrcp.f32 %v129_v25 }
 0x181   :  { %v151_v26 = vpop.eup %150 }
 0x182   :  { %132 = vst.msk [vmem:[%s192_s2] sm:$0x3] %vm15_vm0, %v151_v26 }

</bundles_post_ra>
